<compile_context>
chip_gen: v7x
topology: tpu7x:2x2x1
jax: 0.10.0
libtpu: 0.0.40
codegen_flags: <defaults>
</compile_context>

<pallas_src>
import functools

import jax
import jax.numpy as jnp
from jax.experimental import pallas as pl
from jax.experimental.pallas import tpu as pltpu

_MiB = 1024 * 1024


def se_block_kernel(x_ref, w1_ref, w2_ref, o_ref, *, inv_hw):
    # x_ref / o_ref: (Bt, C, HW)   w1_ref: (C//r, C)   w2_ref: (C, C//r)
    x = x_ref[...]

    # Squeeze: global average pool over spatial dims.  f32 accumulation via the
    # reduce's accumulator dtype -- no materialized full-tile f32 upcast.
    y = jnp.sum(x, axis=-1, dtype=jnp.float32) * inv_hw              # (Bt, C)

    # Excitation: Linear -> ReLU -> Linear -> Sigmoid (bias-free).
    w1 = w1_ref[...]
    h = jax.lax.dot_general(y.astype(w1.dtype), w1,
                            (((1,), (1,)), ((), ())),
                            preferred_element_type=jnp.float32)      # (Bt, C//r)
    h = jnp.maximum(h, 0.0)
    w2 = w2_ref[...]
    s = jax.lax.dot_general(h.astype(w2.dtype), w2,
                            (((1,), (1,)), ((), ())),
                            preferred_element_type=jnp.float32)      # (Bt, C)
    gate = jax.nn.sigmoid(s).astype(o_ref.dtype)                     # (Bt, C)

    # Scale: single vectorized multiply; (Bt, C, 1) lane-broadcasts over HW.
    o_ref[...] = (x * gate[:, :, None]).astype(o_ref.dtype)


def _tpu_memory_params():
    """Return (vmem_tile_budget, vmem_limit_bytes, multi_tensorcore)."""
    vmem_cap = 128 * _MiB
    try:
        info = pltpu.get_tpu_info()
        vmem_cap = int(getattr(info, "vmem_capacity_bytes", vmem_cap))
    except Exception:
        pass
    multi_tc = False
    try:
        multi_tc = "v7" in jax.devices()[0].device_kind.lower()
    except Exception:
        pass
    if vmem_cap <= 64 * _MiB:
        # v7x: 64 MiB / TC -> keep ~40% headroom; it also has 2 TCs.
        return 12 * _MiB, 40 * _MiB, True
    # v5e / v6e: 128 MiB, single TC -> grow tiles, shrink step count.
    return 40 * _MiB, 96 * _MiB, multi_tc


def se_block(x, w1, w2, *, max_bt=16, vmem_tile_budget=None, vmem_limit_bytes=None):
    """x: [B, C, H, W]; w1: [C//r, C] (fc1 weight); w2: [C, C//r] (fc2 weight)."""
    B, C, H, W = x.shape
    Cr, C1 = w1.shape
    assert C1 == C and w2.shape == (C, Cr)

    budget, limit, multi_tc = _tpu_memory_params()
    if vmem_tile_budget is None:
        vmem_tile_budget = budget
    if vmem_limit_bytes is None:
        vmem_limit_bytes = limit

    HW = H * W
    x3 = x.reshape(B, C, HW)                 # no pad: full-extent last block dim

    itemsize = jnp.dtype(x.dtype).itemsize
    per_batch_bytes = C * HW * itemsize
    # Input + output tiles, each double-buffered -> ~4 live tiles of bt rows.
    bt = max(1, vmem_tile_budget // (4 * per_batch_bytes))
    bt = int(min(bt, max_bt, B))
    if multi_tc and B >= 2:
        # Keep >= 2 grid steps only where there are 2 TCs to shard across.
        bt = min(bt, (B + 1) // 2)
    grid = (pl.cdiv(B, bt),)                 # trailing block may be partial;
                                             # batch rows are independent.

    kernel = functools.partial(se_block_kernel, inv_hw=1.0 / float(HW))

    cost = pl.CostEstimate(
        flops=2 * B * C * HW + 4 * B * C * Cr,
        transcendentals=B * C,
        bytes_accessed=2 * B * C * HW * itemsize
        + w1.size * jnp.dtype(w1.dtype).itemsize
        + w2.size * jnp.dtype(w2.dtype).itemsize,
    )

    out = pl.pallas_call(
        kernel,
        out_shape=jax.ShapeDtypeStruct((B, C, HW), x.dtype),
        grid_spec=pltpu.PrefetchScalarGridSpec(
            num_scalar_prefetch=0,
            grid=grid,
            in_specs=[
                pl.BlockSpec((bt, C, HW), lambda i: (i, 0, 0)),
                # Constant-index weight tiles (tiny for typical C; left with
                # default buffering -- single-buffering only matters at large C).
                pl.BlockSpec((Cr, C), lambda i: (0, 0)),
                pl.BlockSpec((C, Cr), lambda i: (0, 0)),
            ],
            out_specs=pl.BlockSpec((bt, C, HW), lambda i: (i, 0, 0)),
        ),
        compiler_params=pltpu.CompilerParams(
            dimension_semantics=("parallel",),
            vmem_limit_bytes=vmem_limit_bytes,
        ),
        cost_estimate=cost,
    )(x3, w1, w2)

    return out.reshape(B, C, H, W)


def se_block_ref(x, w1, w2):
    # Pure-JAX reference for sanity checking.
    y = jnp.mean(x, axis=(2, 3))                 # (B, C)
    h = jnp.maximum(y @ w1.T, 0.0)               # (B, C//r)
    s = jax.nn.sigmoid(h @ w2.T)                 # (B, C)
    return x * s[:, :, None, None]


def _make_inputs(key, B, C, Cr, H, W):
    kx, k1, k2 = jax.random.split(key, 3)
    x = jax.random.normal(kx, (B, C, H, W), dtype=jnp.float32)
    w1 = jax.random.normal(k1, (Cr, C), dtype=jnp.float32) * (1.0 / jnp.sqrt(C))
    w2 = jax.random.normal(k2, (C, Cr), dtype=jnp.float32) * (1.0 / jnp.sqrt(Cr))
    return x, w1, w2


if __name__ == "__main__":
    reduction = 16
    key = jax.random.PRNGKey(0)
    k_a, k_b = jax.random.split(key)

    # Case 1: aligned spatial extent (HW = 256), batch divides the tile.
    B, C, H, W = 2, 64, 16, 16
    Cr = C // reduction
    x, w1, w2 = _make_inputs(k_a, B, C, Cr, H, W)
    out = jax.block_until_ready(se_block(x, w1, w2))
    ref = jax.block_until_ready(se_block_ref(x, w1, w2))
    assert out.shape == (B, C, H, W)
    assert jnp.allclose(out, ref, atol=1e-5, rtol=1e-5)

    # Case 2: HW = 49 (not a multiple of 128, no pad needed) and a partial
    # trailing batch block (B=3, bt=2 via max_bt).
    B2, H2, W2 = 3, 7, 7
    x2, w1b, w2b = _make_inputs(k_b, B2, C, Cr, H2, W2)
    out2 = jax.block_until_ready(se_block(x2, w1b, w2b, max_bt=2))
    ref2 = jax.block_until_ready(se_block_ref(x2, w1b, w2b))
    assert out2.shape == (B2, C, H2, W2)
    assert jnp.allclose(out2, ref2, atol=1e-5, rtol=1e-5)

    print("KERNEL_OK")
</pallas_src>

<mosaic_0001>
module attributes {stable_mosaic.version = 11 : i64} {
  func.func @se_block_kernel(%arg0: i32, %arg1: memref<2x64x256xf32, #tpu.memory_space<vmem>>, %arg2: memref<4x64xf32, #tpu.memory_space<vmem>>, %arg3: memref<64x4xf32, #tpu.memory_space<vmem>>, %arg4: memref<2x64x256xf32, #tpu.memory_space<vmem>>) attributes {dimension_semantics = [#tpu.dimension_semantics<parallel>], iteration_bounds = array<i64: 1>, scalar_prefetch = 0 : i64, scratch_operands = 0 : i64, tpu.core_type = #tpu.core_type<tc>, window_params = [{transform_indices = @transform_0, window_bounds = array<i64: 2, 64, 256>}, {pipeline_mode = #tpu.pipeline_mode<synchronous>, transform_indices = @transform_1, window_bounds = array<i64: 4, 64>}, {pipeline_mode = #tpu.pipeline_mode<synchronous>, transform_indices = @transform_2, window_bounds = array<i64: 64, 4>}, {transform_indices = @transform_3, window_bounds = array<i64: 2, 64, 256>}]} {
    %c0 = arith.constant 0 : index
    %c0_0 = arith.constant 0 : index
    %c0_1 = arith.constant 0 : index
    %0 = vector.load %arg1[%c0, %c0_0, %c0_1] : memref<2x64x256xf32, #tpu.memory_space<vmem>>, vector<2x64x256xf32>
    %cst = arith.constant dense<0.000000e+00> : vector<2x64xf32>
    %1 = vector.multi_reduction <add>, %0, %cst [2] : vector<2x64x256xf32> to vector<2x64xf32>
    %cst_2 = arith.constant 3.906250e-03 : f32
    %2 = vector.broadcast %cst_2 : f32 to vector<2x64xf32>
    %3 = arith.mulf %1, %2 : vector<2x64xf32>
    %c0_3 = arith.constant 0 : index
    %c0_4 = arith.constant 0 : index
    %4 = vector.load %arg2[%c0_3, %c0_4] : memref<4x64xf32, #tpu.memory_space<vmem>>, vector<4x64xf32>
    %cst_5 = arith.constant dense<0.000000e+00> : vector<2x4xf32>
    %5 = tpu.matmul %3, %4, %cst_5 {dimension_numbers = #tpu.dot_dimension_numbers<[1], [1], [0], [0], [0, 0, 1, 0], [], []>} : vector<2x64xf32>, vector<4x64xf32>, vector<2x4xf32> -> vector<2x4xf32>
    %cst_6 = arith.constant 0.000000e+00 : f32
    %6 = vector.broadcast %cst_6 : f32 to vector<2x4xf32>
    %7 = arith.maximumf %5, %6 : vector<2x4xf32>
    %c0_7 = arith.constant 0 : index
    %c0_8 = arith.constant 0 : index
    %8 = vector.load %arg3[%c0_7, %c0_8] : memref<64x4xf32, #tpu.memory_space<vmem>>, vector<64x4xf32>
    %cst_9 = arith.constant dense<0.000000e+00> : vector<2x64xf32>
    %9 = tpu.matmul %7, %8, %cst_9 {dimension_numbers = #tpu.dot_dimension_numbers<[1], [1], [0], [0], [0, 0, 1, 0], [], []>} : vector<2x4xf32>, vector<64x4xf32>, vector<2x64xf32> -> vector<2x64xf32>
    %10 = arith.negf %9 : vector<2x64xf32>
    %11 = math.exp %10 : vector<2x64xf32>
    %cst_10 = arith.constant 1.000000e+00 : f32
    %12 = vector.broadcast %cst_10 : f32 to vector<2x64xf32>
    %13 = arith.addf %12, %11 : vector<2x64xf32>
    %14 = arith.divf %12, %13 : vector<2x64xf32>
    %15 = vector.shape_cast %14 : vector<2x64xf32> to vector<2x64x1xf32>
    %16 = vector.broadcast %15 : vector<2x64x1xf32> to vector<2x64x256xf32>
    %17 = arith.mulf %0, %16 : vector<2x64x256xf32>
    %c0_11 = arith.constant 0 : index
    %c0_12 = arith.constant 0 : index
    %c0_13 = arith.constant 0 : index
    %18 = vector.load %arg4[%c0_11, %c0_12, %c0_13] : memref<2x64x256xf32, #tpu.memory_space<vmem>>, vector<2x64x256xf32>
    tpu.vector_store %arg4[%c0_11, %c0_12, %c0_13], %17 {strides = array<i32>} : memref<2x64x256xf32, #tpu.memory_space<vmem>>, vector<2x64x256xf32>,
    return
  }
  func.func @transform_0(%arg0: i32) -> (i32, i32, i32) {
    %c0_i32 = arith.constant 0 : i32
    %c0_i32_0 = arith.constant 0 : i32
    %c0_i32_1 = arith.constant 0 : i32
    return %arg0, %c0_i32, %c0_i32_0 : i32, i32, i32
  }
  func.func @transform_1(%arg0: i32) -> (i32, i32) {
    %c0_i32 = arith.constant 0 : i32
    %c0_i32_0 = arith.constant 0 : i32
    %c0_i32_1 = arith.constant 0 : i32
    return %c0_i32, %c0_i32_0 : i32, i32
  }
  func.func @transform_2(%arg0: i32) -> (i32, i32) {
    %c0_i32 = arith.constant 0 : i32
    %c0_i32_0 = arith.constant 0 : i32
    %c0_i32_1 = arith.constant 0 : i32
    return %c0_i32, %c0_i32_0 : i32, i32
  }
  func.func @transform_3(%arg0: i32) -> (i32, i32, i32) {
    %c0_i32 = arith.constant 0 : i32
    %c0_i32_0 = arith.constant 0 : i32
    %c0_i32_1 = arith.constant 0 : i32
    return %arg0, %c0_i32, %c0_i32_0 : i32, i32, i32
  }
}

</mosaic_0001>

<bundles_post_ra>
// kernel: tpu_custom_call.1
= control target key start
LH: loop header
LB: loop body
LE: loop exit
PB: predicated region body
PF: predicated region fallthrough
CT: control target
= control target key end

     0   :  { %8 = vsyncpa [#allocation3], 0  ;;  %s1037_s0 = inlined_call_operand.hbm [shape: f32[2,64,256], index: 0, kind: input, shape index: {}]   ;;  %s1038_s1 = inlined_call_operand.hbm [shape: f32[4,64], index: 1, kind: input, shape index: {}]   ;;  %s1039_s2 = inlined_call_operand.hbm [shape: f32[64,4], index: 2, kind: input, shape index: {}]   ;;  %s1040_s3 = inlined_call_operand.hbm [shape: f32[2,64,256], index: 3, kind: output, shape index: {}]  }
   0x1   :  { %9 = vsyncpa [#allocation6], 0 }
   0x2   :  { %10 = vsyncpa [#allocation4], 0  ;;  %s776_s12 = smov [#allocation5]   ;;  %s777_s14 = smov [#allocation2]  }
   0x3   :  { %s29_s13 = sshll.u32 %s776_s12, 4  ;;  %s16_s15 = sshll.u32 %s777_s14, 4  ;;  %s30_s13 = int_to_ptr.vmem [resolvable:$true] %s29_s13  ;;  %s807_s15 = int_to_ptr.vmem [resolvable:$true] %s16_s15 }
   0x4   :  { %s682_s18 = scalar_lea.hbm %s1038_s1, 64 }
   0x5   :  { %p683_p0 = scmp.ne.s32.totalorder %s1038_s1, %s682_s18  ;;  %p686_p1 = scmp.lt.u32.totalorder %s682_s18, %s1038_s1 }
   0x7   :  { %p688_p2 = pnand %p686_p1, %p683_p0 }
   0x9   :  { %691 = shalt.err (!%p688_p2)
}
   0xa   :  { %s692_s23 = scalar_lea.vmem %s30_s13, 64  ;;  %p697_p4 = scmp.lt.s32.totalorder %s30_s13, %s30_s13 }
   0xb   :  { %p693_p3 = scmp.ne.s32.totalorder %s30_s13, %s692_s23  ;;  %p698_p5 = scmp.lt.s32.totalorder %s692_s23, %s692_s23 }
   0xd   :  { %p699_p6 = por %p698_p5, %p697_p4 }
   0xf   :  { %p700_p7 = pnand %p699_p6, %p693_p3 }
  0x11   :  { %703 = shalt.err (!%p700_p7)
}
  0x12   :  { %32 = dma.hbm_to_vmem [thread:$0]  %s1038_s1, 64, %s30_s13, [#allocation6]  }
  0x13   :  { %s704_s28 = scalar_lea.hbm %s1037_s0, 4096 }
  0x14   :  { %p705_p8 = scmp.ne.s32.totalorder %s1037_s0, %s704_s28  ;;  %p708_p9 = scmp.lt.u32.totalorder %s704_s28, %s1037_s0 }
  0x16   :  { %p710_p10 = pnand %p708_p9, %p705_p8 }
  0x18   :  { %713 = shalt.err (!%p710_p10)
}
  0x19   :  { %s714_s6 = scalar_lea.vmem %s807_s15, 4096  ;;  %p719_p12 = scmp.lt.s32.totalorder %s807_s15, %s807_s15 }
  0x1a   :  { %p715_p11 = scmp.ne.s32.totalorder %s807_s15, %s714_s6  ;;  %p720_p13 = scmp.lt.s32.totalorder %s714_s6, %s714_s6 }
  0x1c   :  { %p721_p0 = por %p720_p13, %p719_p12 }
  0x1e   :  { %p722_p1 = pnand %p721_p0, %p715_p11 }
  0x20   :  { %725 = shalt.err (!%p722_p1)
}
  0x21   :  { %s778_s1 = smov 256   ;;  %s779_s7 = smov 16  }
  0x22   :  { %22 = dma.hbm_to_vmem [thread:$0]  %s1037_s0, 4096, %s807_s15, [#allocation3], %s778_s1, %s778_s1, %s779_s7  }
  0x23   :  { %s780_s10 = smov [#allocation7]   ;;  %s726_s14 = scalar_lea.hbm %s1039_s2, 1024 }
  0x24   :  { %s38_s11 = sshll.u32 %s780_s10, 4  ;;  %p727_p2 = scmp.ne.s32.totalorder %s1039_s2, %s726_s14  ;;  %s39_s11 = int_to_ptr.vmem [resolvable:$true] %s38_s11 }
  0x25   :  { %p730_p3 = scmp.lt.u32.totalorder %s726_s14, %s1039_s2 }
  0x27   :  { %p732_p4 = pnand %p730_p3, %p727_p2 }
  0x29   :  { %735 = shalt.err (!%p732_p4)
}
  0x2a   :  { %s736_s20 = scalar_lea.vmem %s39_s11, 1024  ;;  %p741_p6 = scmp.lt.s32.totalorder %s39_s11, %s39_s11 }
  0x2b   :  { %p737_p5 = scmp.ne.s32.totalorder %s39_s11, %s736_s20  ;;  %p742_p7 = scmp.lt.s32.totalorder %s736_s20, %s736_s20 }
  0x2d   :  { %p743_p8 = por %p742_p7, %p741_p6 }
  0x2f   :  { %p744_p9 = pnand %p743_p8, %p737_p5 }
  0x31   :  { %747 = shalt.err (!%p744_p9)
}
  0x32   :  { %s781_s0 = smov 128   ;;  %s782_s15 = smov 8  }
  0x33   :  { %44 = dma.hbm_to_vmem [thread:$0]  %s1039_s2, 1024, %s39_s11, [#allocation6], %s781_s0, %s781_s0, %s782_s15  }
  0x34   :  { %770 = dma.done.wait [#allocation3], 4096  }
  0x35   :  { %771 = vsyncadd [#allocation3], 4294963200 }
  0x36   :  { %772 = dma.done.wait [#allocation6], 1088  }
  0x37   :  { %773 = vsyncadd [#allocation6], 4294966208  ;;  %v853_v0 = vld [vmem:[#allocation2 + $0x80] sm:$0xff]  ;;  %v855_v1 = vld [vmem:[#allocation2 + $0x88] sm:$0xff]  ;;  %v783_v48 = vmov 0.0   ;;  %vm263_vm0 = vcmask 523264  }
  0x38   :  { %v857_v2 = vld [vmem:[#allocation2] sm:$0xff]  ;;  %v110_v3 = vadd.f32 %v855_v1, %v853_v0  ;;  %v861_v4 = vld [vmem:[#allocation2 + $0x8] sm:$0xff]  ;;  %v863_v5 = vld [vmem:[#allocation2 + $0x90] sm:$0xff]  ;;  %627 = vmatprep.subr.mxu0 %v783_v48  ;;  %vm784_vm1 = vmmov 0   ;;  %vm348_vm2 = vcmask 31744   ;;  %v785_v52 = vmov 0.0|0.0  }
  0x39   :  { %v865_v6 = vld [vmem:[#allocation2 + $0x98] sm:$0xff]  ;;  %v86_v7 = vadd.f32 %v861_v4, %v857_v2  ;;  %v869_v8 = vld [vmem:[#allocation2 + $0x10] sm:$0xff]  ;;  %v877_v12 = vld [vmem:[#allocation2 + $0xa0] sm:$0xff]  ;;  %629 = vmatprep.mubr.msk.f32.mxu0 %vm784_vm1, %v783_v48  ;;  %648 = vmatprep.mubr.msk.f32.mxu1 %vm784_vm1, %v783_v48  ;;  %vm178_vm4 = vcmask 130112   ;;  %vm185_vm5 = vcmask 195712   ;;  %vm192_vm6 = vcmask 261312  }
  0x3a   :  { %v871_v9 = vld [vmem:[#allocation2 + $0x18] sm:$0xff]  ;;  %111 = vadd.xlane.f32.xlu1 %v110_v3  ;;  %v113_v10 = vadd.f32 %v865_v6, %v863_v5  ;;  %v879_v13 = vld [vmem:[#allocation2 + $0xa8] sm:$0xff]  ;;  %v881_v14 = vld [vmem:[#allocation2 + $0x20] sm:$0xff]  ;;  %651 = vmatprep.subr.bf16.mxu1 %v785_v52  ;;  %vm199_vm7 = vcmask 326912   ;;  %vm206_vm8 = vcmask 392512   ;;  %vm213_vm9 = vcmask 458112  }
  0x3b   :  { %87 = vadd.xlane.f32.xlu0 %v86_v7  ;;  %v89_v11 = vadd.f32 %v871_v9, %v869_v8  ;;  %v883_v15 = vld [vmem:[#allocation2 + $0x28] sm:$0xff]  ;;  %v116_v16 = vadd.f32 %v879_v13, %v877_v12  ;;  %v889_v18 = vld [vmem:[#allocation2 + $0xb0] sm:$0xff]  ;;  %v891_v19 = vld [vmem:[#allocation2 + $0xb8] sm:$0xff]  ;;  %vm220_vm10 = vcmask 523712   ;;  %vm261_vm11 = vcmask 1041409   ;;  %s786_s2 = smov [#allocation8]  }
  0x3c   :  { %v92_v17 = vadd.f32 %v883_v15, %v881_v14  ;;  %1048 = vst [vmem:[#allocation12_spill] sm:$0xff] %v891_v19  ;;  %v893_v20 = vld [vmem:[#allocation2 + $0x30] sm:$0xff]  ;;  %v895_v21 = vld [vmem:[#allocation2 + $0x38] sm:$0xff]  ;;  %v119_v22 = vadd.f32 %v891_v19, %v889_v18  ;;  %v901_v24 = vld [vmem:[#allocation2 + $0xc0] sm:$0xff]  ;;  %s591_s23 = sshll.u32 %s786_s2, 4  ;;  %s592_s23 = int_to_ptr.vmem [resolvable:$true] %s591_s23 }
  0x3d   :  { %v95_v23 = vadd.f32 %v895_v21, %v893_v20  ;;  %v903_v25 = vld [vmem:[#allocation2 + $0xc8] sm:$0xff]  ;;  %v905_v26 = vld [vmem:[#allocation2 + $0x40] sm:$0xff]  ;;  %v913_v30 = vld [vmem:[#allocation2 + $0xd0] sm:$0xff]  ;;  %s748_s24 = scalar_lea.vmem %s592_s23, 4096  ;;  %p753_p11 = scmp.lt.s32.totalorder %s592_s23, %s592_s23 }
  0x3e   :  { %114 = vadd.xlane.f32.xlu1 %v113_v10  ;;  %v907_v27 = vld [vmem:[#allocation2 + $0x48] sm:$0xff]  ;;  %v122_v28 = vadd.f32 %v903_v25, %v901_v24  ;;  %1049 = vst [vmem:[#allocation13_spill] sm:$0xff] %v913_v30  ;;  %v915_v31 = vld [vmem:[#allocation2 + $0xd8] sm:$0xff]  ;;  %v917_v32 = vld [vmem:[#allocation2 + $0x50] sm:$0xff]  ;;  %p749_p10 = scmp.ne.s32.totalorder %s592_s23, %s748_s24  ;;  %p754_p12 = scmp.lt.s32.totalorder %s748_s24, %s748_s24 }
  0x3f   :  { %90 = vadd.xlane.f32.xlu0 %v89_v11  ;;  %v98_v29 = vadd.f32 %v907_v27, %v905_v26  ;;  %1050 = vst [vmem:[#allocation14_spill] sm:$0xff] %v915_v31  ;;  %v919_v33 = vld [vmem:[#allocation2 + $0x58] sm:$0xff]  ;;  %v125_v34 = vadd.f32 %v915_v31, %v913_v30  ;;  %v925_v36 = vld [vmem:[#allocation2 + $0xe0] sm:$0xff]  ;;  %v927_v37 = vld [vmem:[#allocation2 + $0xe8] sm:$0xff] }
  0x40   :  { %v101_v35 = vadd.f32 %v919_v33, %v917_v32  ;;  %1051 = vst [vmem:[#allocation15_spill] sm:$0xff] %v925_v36  ;;  %1052 = vst [vmem:[#allocation16_spill] sm:$0xff] %v927_v37  ;;  %v929_v38 = vld [vmem:[#allocation2 + $0x60] sm:$0xff]  ;;  %v931_v39 = vld [vmem:[#allocation2 + $0x68] sm:$0xff]  ;;  %v128_v40 = vadd.f32 %v927_v37, %v925_v36  ;;  %p755_p13 = por %p754_p12, %p753_p11 }
  0x41   :  { %v104_v41 = vadd.f32 %v931_v39, %v929_v38  ;;  %v937_v42 = vld [vmem:[#allocation2 + $0xf0] sm:$0xff]  ;;  %v939_v43 = vld [vmem:[#allocation2 + $0xf8] sm:$0xff]  ;;  %v150_v49 = vld [vmem:[#allocation5] sm:$0xf] }
  0x42   :  { %117 = vadd.xlane.f32.xlu1 %v116_v16  ;;  %1053 = vst [vmem:[#allocation17_spill] sm:$0xff] %v937_v42  ;;  %1054 = vst [vmem:[#allocation18_spill] sm:$0xff] %v939_v43  ;;  %v941_v44 = vld [vmem:[#allocation2 + $0x70] sm:$0xff]  ;;  %v943_v45 = vld [vmem:[#allocation2 + $0x78] sm:$0xff]  ;;  %v131_v46 = vadd.f32 %v939_v43, %v937_v42  ;;  %628 = vmatpush3.xpose.msk.msra.mxu0 %vm263_vm0, %v150_v49  ;;  %v167_v16 = vlaneseq  ;;  %p756_p0 = pnand %p755_p13, %p749_p10 }
  0x43   :  { %93 = vadd.xlane.f32.xlu0 %v92_v17  ;;  %v107_v47 = vadd.f32 %v943_v45, %v941_v44  ;;  %v340_v50 = vld [vmem:[#allocation7] sm:$0xff]  ;;  %v341_v51 = vld [vmem:[#allocation7 + $0x8] sm:$0xff]  ;;  %vm952_vm3 = vmpackc.low %vm348_vm2, %vm348_vm2 }
  0x44   :  { %v652_v53 = vpack.c.bf16 %v341_v51, %v340_v50  ;;  %v342_v55 = vld [vmem:[#allocation7 + $0x10] sm:$0xff]  ;;  %v343_v56 = vld [vmem:[#allocation7 + $0x18] sm:$0xff]  ;;  %v344_v58 = vld [vmem:[#allocation7 + $0x20] sm:$0xff] }
  0x45   :  { %v656_v57 = vpack.c.bf16 %v343_v56, %v342_v55  ;;  %v345_v59 = vld [vmem:[#allocation7 + $0x28] sm:$0xff]  ;;  %v346_v61 = vld [vmem:[#allocation7 + $0x30] sm:$0xff]  ;;  %v347_v62 = vld [vmem:[#allocation7 + $0x38] sm:$0xff] }
  0x46   :  { %120 = vadd.xlane.f32.xlu1 %v119_v22  ;;  %654 = vmatpush3.bf16.xpose.msk.msra.mxu1 %vm952_vm3, %v652_v53  ;;  %v660_v60 = vpack.c.bf16 %v345_v59, %v344_v58  ;;  %v664_v63 = vpack.c.bf16 %v347_v62, %v346_v61 }
  0x47   :  { %96 = vadd.xlane.f32.xlu0 %v95_v23  ;;  %655 = vmatprep.subr.bf16.mxu1 %v785_v52  ;;  %v168_v23 = vand.u32 127, %v167_v16 }
  0x49   :  { %v201_v48 = vadd.s32 4294967256, %v168_v23  ;;  %v208_v53 = vadd.s32 4294967248, %v168_v23 }
  0x4a   :  { %123 = vadd.xlane.f32.xlu1 %v122_v28 }
  0x4b   :  { %99 = vadd.xlane.f32.xlu0 %v98_v29  ;;  %v964_v29 = vshrl.u32 %v167_v16, 7 }
  0x4d   :  { %v171_v49 = vsub.s32 %v168_v23, %v964_v29  ;;  %v204_v59 = vsub.s32 %v201_v48, %v964_v29 }
  0x4e   :  { %126 = vadd.xlane.f32.xlu1 %v125_v34  ;;  %658 = vmatpush3.bf16.xpose.msk.msra.mxu1 %vm952_vm3, %v656_v57 }
  0x4f   :  { %102 = vadd.xlane.f32.xlu0 %v101_v35  ;;  %659 = vmatprep.subr.bf16.mxu1 %v785_v52  ;;  %v173_v35 = vadd.s32 4294967288, %v168_v23 }
  0x51   :  { %v176_v51 = vsub.s32 %v173_v35, %v964_v29 }
  0x52   :  { %129 = vadd.xlane.f32.xlu1 %v128_v40  ;;  %v180_v40 = vadd.s32 4294967280, %v168_v23 }
  0x53   :  { %105 = vadd.xlane.f32.xlu0 %v104_v41  ;;  %v187_v41 = vadd.s32 4294967272, %v168_v23 }
  0x55   :  { %v190_v55 = vsub.s32 %v187_v41, %v964_v29 }
  0x56   :  { %132 = vadd.xlane.f32.xlu1 %v131_v46  ;;  %662 = vmatpush3.bf16.xpose.msk.msra.mxu1 %vm952_vm3, %v660_v60  ;;  %v194_v46 = vadd.s32 4294967264, %v168_v23 }
  0x57   :  { %108 = vadd.xlane.f32.xlu0 %v107_v47  ;;  %663 = vmatprep.subr.bf16.mxu1 %v785_v52  ;;  %v183_v52 = vsub.s32 %v180_v40, %v964_v29 }
  0x58   :  { %v197_v56 = vsub.s32 %v194_v46, %v964_v29  ;;  %v215_v46 = vadd.s32 4294967240, %v168_v23 }
  0x5a   :  { %v218_v23 = vsub.s32 %v215_v46, %v964_v29 }
  0x5e   :  { %666 = vmatpush3.bf16.xpose.msk.msra.mxu1 %vm952_vm3, %v664_v63 }
  0xc7   :  { %v112_v3 = vpop.xlane.xlu1 %111 }
  0xc8   :  { %v88_v7 = vpop.xlane.xlu0 %87  ;;  %v142_v61 = vmul.f32 0.00390625, %v112_v3 }
  0xc9   :  { %v134_v35 = vmul.f32 0.00390625, %v88_v7 }
  0xca   :  { %v225_v37 = vrot.slane %v142_v61, %v171_v49 }
  0xcb   :  { %v115_v10 = vpop.xlane.xlu1 %114  ;;  %v172_v19 = vrot.slane %v134_v35, %v171_v49 }
  0xcc   :  { %v91_v11 = vpop.xlane.xlu0 %90  ;;  %v143_v54 = vmul.f32 0.00390625, %v115_v10  ;;  %v211_v10 = vsub.s32 %v208_v53, %v964_v29 }
  0xcd   :  { %v135_v57 = vmul.f32 0.00390625, %v91_v11 }
  0xce   :  { %v229_v41 = vrot.slane %v143_v54, %v176_v51 }
  0xcf   :  { %v118_v17 = vpop.xlane.xlu1 %117  ;;  %v177_v11 = vrot.slane %v135_v57, %v176_v51 }
  0xd0   :  { %v94_v22 = vpop.xlane.xlu0 %93  ;;  %v144_v58 = vmul.f32 0.00390625, %v118_v17  ;;  %v230_v53 = vsel %vm178_vm4, %v229_v41, %v225_v37 }
  0xd1   :  { %v136_v62 = vmul.f32 0.00390625, %v94_v22  ;;  %v179_v51 = vsel %vm178_vm4, %v177_v11, %v172_v19 }
  0xd2   :  { %v234_v17 = vrot.slane %v144_v58, %v183_v52 }
  0xd3   :  { %v121_v28 = vpop.xlane.xlu1 %120  ;;  %v184_v3 = vrot.slane %v136_v62, %v183_v52 }
  0xd4   :  { %v97_v34 = vpop.xlane.xlu0 %96  ;;  %v145_v63 = vmul.f32 0.00390625, %v121_v28  ;;  %v235_v57 = vsel %vm185_vm5, %v234_v17, %v230_v53  ;;  %v489_v53 = vsub.s32 1, %v964_v29 }
  0xd5   :  { %v137_v40 = vmul.f32 0.00390625, %v97_v34  ;;  %v186_v61 = vsel %vm185_vm5, %v184_v3, %v179_v51 }
  0xd6   :  { %v239_v22 = vrot.slane %v145_v63, %v190_v55 }
  0xd7   :  { %v124_v47 = vpop.xlane.xlu1 %123  ;;  %v191_v7 = vrot.slane %v137_v40, %v190_v55 }
  0xd8   :  { %v100_v50 = vpop.xlane.xlu0 %99  ;;  %v146_v43 = vmul.f32 0.00390625, %v124_v47  ;;  %v240_v49 = vsel %vm192_vm6, %v239_v22, %v235_v57 }
  0xd9   :  { %v138_v42 = vmul.f32 0.00390625, %v100_v50  ;;  %v193_v37 = vsel %vm192_vm6, %v191_v7, %v186_v61  ;;  %v454_v7 = vsub.s32 0, %v964_v29 }
  0xda   :  { %v244_v34 = vrot.slane %v146_v43, %v197_v56 }
  0xdb   :  { %v127_v60 = vpop.xlane.xlu1 %126  ;;  %v198_v54 = vrot.slane %v138_v42, %v197_v56 }
  0xdc   :  { %v103_v16 = vpop.xlane.xlu0 %102  ;;  %v147_v31 = vmul.f32 0.00390625, %v127_v60 }
  0xdd   :  { %v139_v30 = vmul.f32 0.00390625, %v103_v16  ;;  %v200_v19 = vsel %vm199_vm7, %v198_v54, %v193_v37 }
  0xde   :  { %v249_v50 = vrot.slane %v147_v31, %v204_v59  ;;  %v245_v31 = vsel %vm199_vm7, %v244_v34, %v240_v49 }
  0xdf   :  { %v130_v48 = vpop.xlane.xlu1 %129  ;;  %v205_v58 = vrot.slane %v139_v30, %v204_v59 }
  0xe0   :  { %v148_v28 = vmul.f32 0.00390625, %v130_v48  ;;  %v106_v36 = vpop.xlane.xlu0 %105  ;;  %v250_v56 = vsel %vm206_vm8, %v249_v50, %v245_v31 }
  0xe1   :  { %v140_v47 = vmul.f32 0.00390625, %v106_v36  ;;  %v207_v59 = vsel %vm206_vm8, %v205_v58, %v200_v19 }
  0xe2   :  { %v254_v60 = vrot.slane %v148_v28, %v211_v10 }
  0xe3   :  { %v133_v52 = vpop.xlane.xlu1 %132  ;;  %v212_v55 = vrot.slane %v140_v47, %v211_v10 }
  0xe4   :  { %v149_v43 = vmul.f32 0.00390625, %v133_v52  ;;  %v109_v36 = vpop.xlane.xlu0 %108  ;;  %v255_v62 = vsel %vm213_vm9, %v254_v60, %v250_v56 }
  0xe5   :  { %v141_v42 = vmul.f32 0.00390625, %v109_v36  ;;  %v214_v16 = vsel %vm213_vm9, %v212_v55, %v207_v59  ;;  %v1057_v59 = vld [vmem:[#allocation12_spill] sm:$0xff] }
  0xe6   :  { %v259_v30 = vrot.slane %v149_v43, %v218_v23 }
  0xe7   :  { %v219_v63 = vrot.slane %v141_v42, %v218_v23 }
  0xe8   :  { %v260_v35 = vsel %vm220_vm10, %v259_v30, %v255_v62 }
  0xe9   :  { %v221_v40 = vsel %vm220_vm10, %v219_v63, %v214_v16  ;;  %v1058_v63 = vld [vmem:[#allocation15_spill] sm:$0xff] }
  0xea   :  { %v262_v10 = vsel %vm261_vm11, %v260_v35, %v221_v40  ;;  %v1059_v35 = vld [vmem:[#allocation16_spill] sm:$0xff]  ;;  %v1061_v40 = vld [vmem:[#allocation14_spill] sm:$0xff] }
  0xeb   :  { %630 = vmatmul.mubr.msk.f32.vlgmr.msra.gmra.mrb[0].mxu0 %vm263_vm0, %v262_v10 }
 0x1be   :  { %v335_v41 = vpop.f32.mrb[0].mxu0 }
 0x1bf   :  { %v339_v46 = vmax.f32 %v335_v41, 0.0  ;;  %v631_v11 = vpop.f32.mrb[1].mxu0  ;;  %v1062_v41 = vld [vmem:[#allocation17_spill] sm:$0xff] }
 0x1c0   :  { %v1063_v11 = vld [vmem:[#allocation18_spill] sm:$0xff] }
 0x1c1   :  { %649 = vmatmul.mubr.msk.f32.vlgmr.msra.gmra.mrb[0].mxu1 %vm348_vm2, %v339_v46 }
 0x294   :  { %v442_v17 = vpop.f32.mrb[0].mxu1 }
 0x295   :  { %v615_v48 = vmul.f32 -1.442695, %v442_v17  ;;  %v650_v3 = vpop.f32.mrb[1].mxu1 }
 0x297   :  { %678 = vpow2.f32 %v615_v48 }
 0x2a1   :  { %v679_v22 = vpop.eup %678 }
 0x2a2   :  { %v449_v28 = vadd.f32 1.0, %v679_v22 }
 0x2a4   :  { %680 = vrcp.f32 %v449_v28 }
 0x2ae   :  { %v681_v34 = vpop.eup %680 }
 0x2af   :  { %v455_v47 = vrot.slane %v681_v34, %v454_v7  ;;  %v490_v54 = vrot.slane %v681_v34, %v489_v53 }
 0x2b1   :  { %461 = vbcast.lane.b32.xlu1 %v455_v47, 264  ;;  %457 = vbcast.lane.b32.xlu0 %v455_v47, 256 }
 0x2b5   :  { %465 = vbcast.lane.b32.xlu1 %v455_v47, 272  ;;  %473 = vbcast.lane.b32.xlu0 %v455_v47, 288 }
 0x2b9   :  { %469 = vbcast.lane.b32.xlu1 %v455_v47, 280  ;;  %481 = vbcast.lane.b32.xlu0 %v455_v47, 304 }
 0x2bd   :  { %477 = vbcast.lane.b32.xlu1 %v455_v47, 296  ;;  %492 = vbcast.lane.b32.xlu0 %v490_v54, 256 }
 0x2c1   :  { %485 = vbcast.lane.b32.xlu1 %v455_v47, 312  ;;  %500 = vbcast.lane.b32.xlu0 %v490_v54, 272 }
 0x2c5   :  { %496 = vbcast.lane.b32.xlu1 %v490_v54, 264  ;;  %508 = vbcast.lane.b32.xlu0 %v490_v54, 288 }
 0x2c9   :  { %504 = vbcast.lane.b32.xlu1 %v490_v54, 280  ;;  %516 = vbcast.lane.b32.xlu0 %v490_v54, 304 }
 0x2cd   :  { %512 = vbcast.lane.b32.xlu1 %v490_v54, 296 }
 0x2d1   :  { %520 = vbcast.lane.b32.xlu1 %v490_v54, 312 }
 0x323   :  { %v462_v50 = vpop.permute.xlu1 %461  ;;  %v458_v23 = vpop.permute.xlu0 %457 }
 0x324   :  { %v524_v51 = vmul.f32 %v462_v50, %v869_v8  ;;  %v525_v57 = vmul.f32 %v462_v50, %v871_v9  ;;  %v522_v29 = vmul.f32 %v458_v23, %v857_v2  ;;  %v523_v58 = vmul.f32 %v458_v23, %v861_v4 }
 0x326   :  { %556 = vst [vmem:[#allocation8 + $0x10] sm:$0xff] %v524_v51  ;;  %557 = vst [vmem:[#allocation8 + $0x18] sm:$0xff] %v525_v57 }
 0x327   :  { %554 = vst [vmem:[#allocation8] sm:$0xff] %v522_v29  ;;  %555 = vst [vmem:[#allocation8 + $0x8] sm:$0xff] %v523_v58  ;;  %v466_v60 = vpop.permute.xlu1 %465  ;;  %v474_v52 = vpop.permute.xlu0 %473 }
 0x328   :  { %v526_v61 = vmul.f32 %v466_v60, %v881_v14  ;;  %v527_v49 = vmul.f32 %v466_v60, %v883_v15  ;;  %v530_v55 = vmul.f32 %v474_v52, %v905_v26  ;;  %v531_v8 = vmul.f32 %v474_v52, %v907_v27 }
 0x32a   :  { %558 = vst [vmem:[#allocation8 + $0x20] sm:$0xff] %v526_v61  ;;  %559 = vst [vmem:[#allocation8 + $0x28] sm:$0xff] %v527_v49 }
 0x32b   :  { %562 = vst [vmem:[#allocation8 + $0x40] sm:$0xff] %v530_v55  ;;  %563 = vst [vmem:[#allocation8 + $0x48] sm:$0xff] %v531_v8  ;;  %v470_v2 = vpop.permute.xlu1 %469  ;;  %v482_v4 = vpop.permute.xlu0 %481 }
 0x32c   :  { %v528_v9 = vmul.f32 %v470_v2, %v893_v20  ;;  %v529_v43 = vmul.f32 %v470_v2, %v895_v21  ;;  %v534_v36 = vmul.f32 %v482_v4, %v929_v38  ;;  %v535_v14 = vmul.f32 %v482_v4, %v931_v39 }
 0x32e   :  { %560 = vst [vmem:[#allocation8 + $0x30] sm:$0xff] %v528_v9  ;;  %561 = vst [vmem:[#allocation8 + $0x38] sm:$0xff] %v529_v43 }
 0x32f   :  { %566 = vst [vmem:[#allocation8 + $0x60] sm:$0xff] %v534_v36  ;;  %567 = vst [vmem:[#allocation8 + $0x68] sm:$0xff] %v535_v14  ;;  %v478_v15 = vpop.permute.xlu1 %477  ;;  %v493_v26 = vpop.permute.xlu0 %492 }
 0x330   :  { %v532_v27 = vmul.f32 %v478_v15, %v917_v32  ;;  %v533_v37 = vmul.f32 %v478_v15, %v919_v33  ;;  %v538_v31 = vmul.f32 %v493_v26, %v853_v0  ;;  %v539_v20 = vmul.f32 %v493_v26, %v855_v1 }
 0x332   :  { %564 = vst [vmem:[#allocation8 + $0x50] sm:$0xff] %v532_v27  ;;  %565 = vst [vmem:[#allocation8 + $0x58] sm:$0xff] %v533_v37 }
 0x333   :  { %570 = vst [vmem:[#allocation8 + $0x80] sm:$0xff] %v538_v31  ;;  %571 = vst [vmem:[#allocation8 + $0x88] sm:$0xff] %v539_v20  ;;  %v486_v21 = vpop.permute.xlu1 %485  ;;  %v501_v38 = vpop.permute.xlu0 %500 }
 0x334   :  { %v536_v39 = vmul.f32 %v486_v21, %v941_v44  ;;  %v537_v42 = vmul.f32 %v486_v21, %v943_v45  ;;  %v542_v19 = vmul.f32 %v501_v38, %v877_v12  ;;  %v543_v32 = vmul.f32 %v501_v38, %v879_v13 }
 0x336   :  { %568 = vst [vmem:[#allocation8 + $0x70] sm:$0xff] %v536_v39  ;;  %569 = vst [vmem:[#allocation8 + $0x78] sm:$0xff] %v537_v42 }
 0x337   :  { %574 = vst [vmem:[#allocation8 + $0xa0] sm:$0xff] %v542_v19  ;;  %575 = vst [vmem:[#allocation8 + $0xa8] sm:$0xff] %v543_v32  ;;  %v497_v0 = vpop.permute.xlu1 %496  ;;  %v509_v1 = vpop.permute.xlu0 %508 }
 0x338   :  { %v540_v33 = vmul.f32 %v497_v0, %v863_v5  ;;  %v541_v56 = vmul.f32 %v497_v0, %v865_v6  ;;  %v546_v30 = vmul.f32 %v509_v1, %v901_v24  ;;  %v547_v44 = vmul.f32 %v509_v1, %v903_v25  ;;  %v1060_v24 = vld [vmem:[#allocation13_spill] sm:$0xff] }
 0x33a   :  { %572 = vst [vmem:[#allocation8 + $0x90] sm:$0xff] %v540_v33  ;;  %573 = vst [vmem:[#allocation8 + $0x98] sm:$0xff] %v541_v56 }
 0x33b   :  { %578 = vst [vmem:[#allocation8 + $0xc0] sm:$0xff] %v546_v30  ;;  %579 = vst [vmem:[#allocation8 + $0xc8] sm:$0xff] %v547_v44  ;;  %v505_v12 = vpop.permute.xlu1 %504  ;;  %v517_v13 = vpop.permute.xlu0 %516 }
 0x33c   :  { %v544_v45 = vmul.f32 %v505_v12, %v889_v18  ;;  %v545_v62 = vmul.f32 %v505_v12, %v1057_v59  ;;  %v550_v16 = vmul.f32 %v517_v13, %v1058_v63  ;;  %v551_v5 = vmul.f32 %v517_v13, %v1059_v35 }
 0x33e   :  { %576 = vst [vmem:[#allocation8 + $0xb0] sm:$0xff] %v544_v45  ;;  %577 = vst [vmem:[#allocation8 + $0xb8] sm:$0xff] %v545_v62 }
 0x33f   :  { %582 = vst [vmem:[#allocation8 + $0xe0] sm:$0xff] %v550_v16  ;;  %583 = vst [vmem:[#allocation8 + $0xe8] sm:$0xff] %v551_v5  ;;  %v513_v6 = vpop.permute.xlu1 %512 }
 0x340   :  { %v548_v25 = vmul.f32 %v513_v6, %v1060_v24  ;;  %v549_v10 = vmul.f32 %v513_v6, %v1061_v40 }
 0x342   :  { %580 = vst [vmem:[#allocation8 + $0xd0] sm:$0xff] %v548_v25  ;;  %581 = vst [vmem:[#allocation8 + $0xd8] sm:$0xff] %v549_v10 }
 0x343   :  { %v521_v18 = vpop.permute.xlu1 %520 }
 0x344   :  { %v552_v46 = vmul.f32 %v521_v18, %v1062_v41  ;;  %v553_v17 = vmul.f32 %v521_v18, %v1063_v11 }
 0x346   :  { %584 = vst [vmem:[#allocation8 + $0xf0] sm:$0xff] %v552_v46  ;;  %585 = vst [vmem:[#allocation8 + $0xf8] sm:$0xff] %v553_v17 }
 0x347   :  { %759 = shalt.err (!%p756_p0)
}
 0x348   :  { %s760_s27 = scalar_lea.hbm %s1040_s3, 4096 }
 0x349   :  { %p761_p1 = scmp.ne.s32.totalorder %s1040_s3, %s760_s27  ;;  %p764_p2 = scmp.lt.u32.totalorder %s760_s27, %s1040_s3 }
 0x34b   :  { %p766_p3 = pnand %p764_p2, %p761_p1 }
 0x34d   :  { %769 = shalt.err (!%p766_p3)
}
 0x34e   :  { %597 = dma.vmem_to_hbm [thread:$0]  %s592_s23, 4096, %s1040_s3, [#allocation4], %s778_s1, %s778_s1, %s779_s7  }
 0x34f   :  { %774 = dma.done.wait [#allocation4], 4096  }
 0x350   :  { %775 = vsyncadd [#allocation4], 4294963200 }
 0x351   :  { %601 = vsyncpa [#allocation3], 1 }
 0x352   :  { %602 = vsyncpa [#allocation6], 1 }
 0x353   :  { %603 = vsyncpa [#allocation4], 1 }

</bundles_post_ra>
